<compile_context>
chip_gen: v5e
topology: v5e:2x2
jax: 0.10.0
libtpu: 0.0.40
codegen_flags: <defaults>
</compile_context>

<pallas_src>
import jax
import jax.numpy as jnp
from jax import lax
from jax.experimental import pallas as pl
from jax.experimental.pallas import tpu as pltpu


def _round_up(n, m):
    return -(-n // m) * m


def _sublane_rows(dtype):
    # sublane packing: 8 rows for 4-byte, 16 for 2-byte, 32 for 1-byte dtypes
    return {1: 32, 2: 16, 4: 8}.get(jnp.dtype(dtype).itemsize, 8)


def _largest_divisor_leq(n, ub):
    ub = max(1, min(n, int(ub)))
    for d in range(ub, 0, -1):
        if n % d == 0:
            return d
    return 1


def _default_vmem_bytes():
    """Returns (vmem_limit_bytes, io_budget_bytes) sized per TPU generation."""
    phys = 128 << 20                      # v5e / v6e physical VMEM
    try:
        kind = jax.devices()[0].device_kind.lower()
        if "v7" in kind:
            phys = 64 << 20               # v7x has half the VMEM
    except Exception:
        pass
    limit = (phys * 3) // 4               # 96 MiB on v5e/v6e, 48 MiB on v7x
    budget = limit - (8 << 20)            # headroom for weights / compiler scratch
    return limit, budget


def _augmenter_kernel(x_ref, w_ref, b_ref, o_ref):
    # x_ref: (TB, C, THW) batch/spatial block
    # w_ref: (C, C)  1x1-conv weight (out_ch, in_ch), resident across the grid
    # b_ref: (C, 1)  conv bias (f32),                 resident across the grid
    w = w_ref[...]
    b = b_ref[...]
    tb = x_ref.shape[0]

    def per_sample(i, carry):
        # One 2-D MXU matmul per sample: (C_out, C_in) @ (C_in, THW),
        # f32 accumulate + f32 bias add; cast once on store.
        y = jnp.dot(w, x_ref[i], preferred_element_type=jnp.float32) + b
        o_ref[i] = y.astype(o_ref.dtype)
        return carry

    # Per-sample loop bounds live data to one (C, THW) f32 slab (no broadcast
    # weight copies, no full-block f32 intermediate -> no vreg spills).
    lax.fori_loop(0, tb, per_sample, 0, unroll=(tb <= 8))


def pair_augmenter(x, weight, bias, *, io_dtype=None,
                   vmem_limit_bytes=None, vmem_budget_bytes=None):
    """Equivalent of PairAugmenter(Conv2d(C, C, 1)).forward(x).

    x:      (B, C, H, W)  NCHW
    weight: (C, C)        1x1 conv weight (out_ch, in_ch)
    bias:   (C,)          conv bias
    io_dtype: optional narrower I/O dtype (e.g. jnp.bfloat16) for the
              bandwidth-bound path; MXU accumulate / bias add stay in f32.
              NOTE: when set, the outputs are returned in io_dtype (differs
              from the PyTorch module, which keeps x.dtype).
    returns (y0, y1), each (B, C, H, W) -- like torch.chunk(.., 2, dim=0).
    The two halves are identical because the augmenter is deterministic.
    """
    B, C, H, W = x.shape
    HW = H * W

    if vmem_limit_bytes is None or vmem_budget_bytes is None:
        d_limit, d_budget = _default_vmem_bytes()
        vmem_limit_bytes = d_limit if vmem_limit_bytes is None else vmem_limit_bytes
        vmem_budget_bytes = d_budget if vmem_budget_bytes is None else vmem_budget_bytes

    out_dtype = io_dtype if io_dtype is not None else x.dtype
    x3 = x.reshape(B, C, HW)
    if io_dtype is not None:
        x3 = x3.astype(io_dtype)
        weight = weight.astype(io_dtype)
    b2 = bias.astype(jnp.float32).reshape(C, 1)

    in_item = jnp.dtype(x3.dtype).itemsize
    out_item = jnp.dtype(out_dtype).itemsize
    c_in_pad = _round_up(C, _sublane_rows(x3.dtype))
    c_out_pad = _round_up(C, _sublane_rows(out_dtype))
    c_f32_pad = _round_up(C, 8)
    margin = 1 << 20  # resident weight/bias + slack

    def per_sample_tile_bytes(thw_pad):
        # one sample's input + output tiles (padded to vreg layout)
        return c_in_pad * thw_pad * in_item + c_out_pad * thw_pad * out_item

    # ---- HW tiling: full HW unless one double-buffered sample overflows ----
    thw = HW
    hw_pad = _round_up(HW, 128)
    need_one = 2 * per_sample_tile_bytes(hw_pad) + c_f32_pad * hw_pad * 4 + margin
    if need_one > vmem_budget_bytes and HW % 128 == 0:
        best = 128
        d = 128
        while d <= HW:
            if HW % d == 0:
                cost = 2 * per_sample_tile_bytes(d) + c_f32_pad * d * 4 + margin
                if cost <= vmem_budget_bytes:
                    best = d
            d += 128
        thw = best
    # TODO(synk): if HW % 128 != 0 AND a single sample still exceeds the VMEM
    # budget, a padded/folded spatial layout would be needed (not handled here).
    thw_pad = _round_up(thw, 128)
    n_hw = HW // thw

    # ---- batch tiling: biggest divisor of B whose double-buffered tiles fit,
    #      accounting for the per-sample f32 intermediate ----
    denom = 2 * per_sample_tile_bytes(thw_pad)
    avail = vmem_budget_bytes - c_f32_pad * thw_pad * 4 - margin
    max_tb = max(1, int(avail // denom))
    tb_ub = min(B, max_tb)
    if n_hw == 1 and B >= 2:
        tb_ub = min(tb_ub, -(-B // 2))  # >= 2 grid blocks so v7x's 2 TCs both work
    tb = _largest_divisor_leq(B, tb_ub)
    n_b = B // tb

    cost = pl.CostEstimate(
        flops=2 * B * C * C * HW,
        transcendentals=0,
        bytes_accessed=B * C * HW * (in_item + out_item) + C * C * in_item + C * 4,
    )

    out = pl.pallas_call(
        _augmenter_kernel,
        out_shape=jax.ShapeDtypeStruct((B, C, HW), out_dtype),
        grid_spec=pltpu.PrefetchScalarGridSpec(
            num_scalar_prefetch=0,
            grid=(n_b, n_hw),
            in_specs=[
                pl.BlockSpec((tb, C, thw), lambda i, j: (i, 0, j)),
                pl.BlockSpec((C, C), lambda i, j: (0, 0)),   # resident weight
                pl.BlockSpec((C, 1), lambda i, j: (0, 0)),   # resident bias
            ],
            out_specs=pl.BlockSpec((tb, C, thw), lambda i, j: (i, 0, j)),
        ),
        compiler_params=pltpu.CompilerParams(
            dimension_semantics=("parallel", "parallel"),    # megacore-shardable
            vmem_limit_bytes=int(vmem_limit_bytes),
        ),
        cost_estimate=cost,
    )(x3, weight, b2)

    y = out.reshape(B, C, H, W)
    # torch.chunk(augmenter(cat([x, x], 0)), 2, 0): deterministic augmenter
    # -> both halves equal conv(x); return it twice instead of computing twice.
    return y, y


if __name__ == "__main__":
    B, C, H, W = 2, 4, 16, 16

    key = jax.random.PRNGKey(0)
    kx, kw, kb = jax.random.split(key, 3)
    x = jax.random.normal(kx, (B, C, H, W), dtype=jnp.float32)
    # deterministic "augmenter" (1x1 conv) parameters
    weight = jax.random.normal(kw, (C, C), dtype=jnp.float32) * 0.1
    bias = jax.random.normal(kb, (C,), dtype=jnp.float32) * 0.1

    y0, y1 = pair_augmenter(x, weight, bias)
    jax.block_until_ready((y0, y1))

    # reference: augmenter(cat([x,x],0)) chunked -> both halves equal conv(x)
    ref = jnp.einsum("oc,bchw->bohw", weight, x) + bias[None, :, None, None]
    assert y0.shape == (B, C, H, W) and y1.shape == (B, C, H, W)
    assert jnp.allclose(y0, ref, atol=1e-5)
    assert jnp.allclose(y1, ref, atol=1e-5)

    # Bandwidth-optimized bf16 I/O path (f32 accumulate preserved in-kernel).
    z0, z1 = pair_augmenter(x, weight, bias, io_dtype=jnp.bfloat16)
    jax.block_until_ready((z0, z1))
    assert jnp.allclose(z0.astype(jnp.float32), ref, atol=3e-2)
    assert jnp.allclose(z1.astype(jnp.float32), ref, atol=3e-2)

    print("KERNEL_OK")
</pallas_src>

<mosaic_0001>
module attributes {stable_mosaic.version = 11 : i64} {
  func.func @_augmenter_kernel(%arg0: i32, %arg1: i32, %arg2: memref<1x4x256xf32, #tpu.memory_space<vmem>>, %arg3: memref<4x4xf32, #tpu.memory_space<vmem>>, %arg4: memref<4x1xf32, #tpu.memory_space<vmem>>, %arg5: memref<1x4x256xf32, #tpu.memory_space<vmem>>) attributes {dimension_semantics = [#tpu.dimension_semantics<parallel>, #tpu.dimension_semantics<parallel>], iteration_bounds = array<i64: 2, 1>, scalar_prefetch = 0 : i64, scratch_operands = 0 : i64, tpu.core_type = #tpu.core_type<tc>, window_params = [{transform_indices = @transform_0, window_bounds = array<i64: 1, 4, 256>}, {pipeline_mode = #tpu.pipeline_mode<synchronous>, transform_indices = @transform_1, window_bounds = array<i64: 4, 4>}, {pipeline_mode = #tpu.pipeline_mode<synchronous>, transform_indices = @transform_2, window_bounds = array<i64: 4, 1>}, {transform_indices = @transform_3, window_bounds = array<i64: 1, 4, 256>}]} {
    %c0 = arith.constant 0 : index
    %c0_0 = arith.constant 0 : index
    %0 = vector.load %arg3[%c0, %c0_0] : memref<4x4xf32, #tpu.memory_space<vmem>>, vector<4x4xf32>
    %c0_1 = arith.constant 0 : index
    %c0_2 = arith.constant 0 : index
    %1 = vector.load %arg4[%c0_1, %c0_2] : memref<4x1xf32, #tpu.memory_space<vmem>>, vector<4x1xf32>
    %c0_i32 = arith.constant 0 : i32
    %2 = arith.index_cast %c0_i32 : i32 to index
    %c0_3 = arith.constant 0 : index
    %c0_4 = arith.constant 0 : index
    %3 = vector.load %arg2[%2, %c0_3, %c0_4] : memref<1x4x256xf32, #tpu.memory_space<vmem>>, vector<1x4x256xf32>
    %4 = vector.shape_cast %3 : vector<1x4x256xf32> to vector<4x256xf32>
    %cst = arith.constant dense<0.000000e+00> : vector<4x256xf32>
    %5 = tpu.matmul %0, %4, %cst {dimension_numbers = #tpu.dot_dimension_numbers<[1], [0], [0], [1], [0, 0, 1, 1], [], []>} : vector<4x4xf32>, vector<4x256xf32>, vector<4x256xf32> -> vector<4x256xf32>
    %6 = vector.broadcast %1 : vector<4x1xf32> to vector<4x256xf32>
    %7 = arith.addf %5, %6 : vector<4x256xf32>
    %8 = arith.index_cast %c0_i32 : i32 to index
    %c0_5 = arith.constant 0 : index
    %c0_6 = arith.constant 0 : index
    %9 = vector.load %arg5[%8, %c0_5, %c0_6] : memref<1x4x256xf32, #tpu.memory_space<vmem>>, vector<1x4x256xf32>
    %10 = vector.shape_cast %9 : vector<1x4x256xf32> to vector<4x256xf32>
    %11 = vector.shape_cast %7 : vector<4x256xf32> to vector<1x4x256xf32>
    tpu.vector_store %arg5[%8, %c0_5, %c0_6], %11 {strides = array<i32>} : memref<1x4x256xf32, #tpu.memory_space<vmem>>, vector<1x4x256xf32>,
    %c1_i32 = arith.constant 1 : i32
    return
  }
  func.func @transform_0(%arg0: i32, %arg1: i32) -> (i32, i32, i32) {
    %c0_i32 = arith.constant 0 : i32
    %c0_i32_0 = arith.constant 0 : i32
    return %arg0, %c0_i32, %arg1 : i32, i32, i32
  }
  func.func @transform_1(%arg0: i32, %arg1: i32) -> (i32, i32) {
    %c0_i32 = arith.constant 0 : i32
    %c0_i32_0 = arith.constant 0 : i32
    %c0_i32_1 = arith.constant 0 : i32
    return %c0_i32, %c0_i32_0 : i32, i32
  }
  func.func @transform_2(%arg0: i32, %arg1: i32) -> (i32, i32) {
    %c0_i32 = arith.constant 0 : i32
    %c0_i32_0 = arith.constant 0 : i32
    %c0_i32_1 = arith.constant 0 : i32
    return %c0_i32, %c0_i32_0 : i32, i32
  }
  func.func @transform_3(%arg0: i32, %arg1: i32) -> (i32, i32, i32) {
    %c0_i32 = arith.constant 0 : i32
    %c0_i32_0 = arith.constant 0 : i32
    return %arg0, %c0_i32, %arg1 : i32, i32, i32
  }
}

</mosaic_0001>

<bundles_post_ra>
// kernel: tpu_custom_call.1
= control target key start
LH: loop header
LB: loop body
LE: loop exit
PB: predicated region body
PF: predicated region fallthrough
CT: control target
= control target key end

     0   :  { %8 = vsyncpa [#allocation3], 0  ;;  %s728_s0 = inlined_call_operand.hbm [shape: f32[2,4,256], index: 0, kind: input, shape index: {}]   ;;  %s729_s1 = inlined_call_operand.vmem [shape: f32[4,4], index: 1, kind: input, shape index: {}]   ;;  %s730_s2 = inlined_call_operand.vmem [shape: f32[4,1], index: 2, kind: input, shape index: {}]   ;;  %s731_s3 = inlined_call_operand.hbm [shape: f32[2,4,256], index: 3, kind: output, shape index: {}]  }
   0x1   :  { %10 = vsyncpa [#allocation3 + $0x1], 0 }
   0x2   :  { %11 = vsyncpa [#allocation4], 0 }
   0x3   :  { %13 = vsyncpa [#allocation4 + $0x1], 0  ;;  %s599_s12 = smov 0   ;;  %s601_s13 = smov 0  }
   0x4   :  { %s603_s14 = smov 0   ;;  %s605_s15 = smov 0  }
   0x5   :  { %s607_s16 = smov 0   ;;  %s609_s17 = smov 0  }
   0x6 LB: > { %s379_s18 = sadd.s32 4294967295, %s576_s17   ;;  %s380_s19 = sadd.s32 4294967294, %s576_s17   ;;  %s576_s17 = sphi %s609_s17, %s19_s17   ;;  %s572_s16 = sphi %s607_s16, %s740_s16   ;;  %s568_s15 = sphi %s605_s15, %s739_s15   ;;  %s564_s14 = sphi %s603_s14, %s738_s14   ;;  %s560_s13 = sphi %s601_s13, %s737_s13   ;;  %s556_s12 = sphi %s599_s12, %s736_s12  }
   0x7   : > { %s31_s20 = sadd.s32 1, %s572_s16  ;;  %s40_s21 = sadd.s32 1, %s564_s14 }
   0x8   : > { %p33_p0 = scmp.ge.s32.totalorder %s31_s20, 2  ;;  %p47_p1 = scmp.ne.s32.totalorder %s564_s14, %s560_s13 }
   0x9   : > { %p48_p2 = scmp.eq.s32.totalorder %s576_s17, 0  ;;  %p53_p3 = scmp.ne.s32.totalorder %s560_s13, %s556_s12 }
   0xa   : > { %s742_s20 = smov (%p33_p0, %s31_s20), 0  ;;  %p54_p5 = scmp.eq.s32.totalorder %s379_s18, 0 }
   0xb   : > { %p640_p4 = por %p48_p2, %p47_p1  ;;  %s35_s23 = ssub.s32 %s572_s16, %s742_s20 }
   0xc   : > { %p121_p6 = scmp.eq.s32.totalorder %s379_s18, 1  ;;  %p38_p7 = scmp.eq.s32.totalorder %s35_s23, 0 }
   0xd   : > { %p646_p8 = por %p54_p5, %p53_p3  ;;  %p127_p10 = scmp.eq.s32.totalorder %s380_s19, 1 }
   0xe   : > { %p650_p9 = por %p121_p6, %p47_p1  ;;  %p382_p12 = scmp.ge.s32.totalorder %s576_s17, 2 }
   0xf   : > { %s655_s26 = scalar_select %p38_p7, %s564_s14, %s40_s21  }
  0x10   : > { %p657_p11 = por %p127_p10, %p53_p3  ;;  %p412_p13 = scmp.lt.s32.totalorder %s576_s17, 2 }
  0x11   : > { %s153_s28 = sand.u32 1, %s564_s14   ;;  %s398_s30 = sshll.u32 %s572_s16, 3 }
  0x12   : > { %s383_s29 = sshll.u32 %s153_s28, 3  ;;  %s164_s6 = scalar_lea.hbm %s728_s0, %s398_s30 }
  0x13   : > { %s157_s7 = scalar_lea.vmem [#allocation2], %s383_s29  ;;  %s166_s9 = sshll.u32 %s164_s6, 4  ;;  %s167_s9 = int_to_ptr.hbm [resolvable:$true] %s166_s9 }
  0x14   : > { %s168_s8 = sshll.u32 %s157_s7, 4  ;;  %p405_p0 = pnand %p412_p13, %p640_p4  ;;  %s169_s8 = int_to_ptr.vmem [resolvable:$true] %s168_s8 }
  0x15   : > { %p386_p1 = scmp.ge.s32.totalorder %s576_s17, 1  ;;  %p173_p2 = scmp.lt.s32.totalorder %s576_s17, 3 }
  0x16   : > { %s154_s10 = scalar_lea.sflag [#allocation3], %s153_s28 }
  0x17   : > { %407 = dma.hbm_to_vmem [thread:$0]  (!%p405_p0), %s167_s9, 128, %s169_s8, %s154_s10  }
  0x18   : > { %p174_p3 = pnand %p386_p1, %p173_p2 }
  0x19   : > { %s673_s11 = sand.u32 (!%p174_p3), 1, %s560_s13  }
  0x1a   : > { %177 = sbr.rel (%p174_p3) target bundleno = 176 (0xb0), region = 32  ;;  %s387_s18 = sshll.u32 (!%p174_p3), %s673_s11, 3 }
  0x1b   : > { %s180_s19 = scalar_lea.sflag (!%p174_p3), [#allocation3], %s673_s11  ;;  %s183_s21 = scalar_lea.vmem (!%p174_p3), [#allocation2], %s387_s18 }
  0x1f   : > { %547 = dma.done.wait (%p646_p8), %s180_s19, 128  }
  0x20   : > { %549 = vsyncadd (%p646_p8), %s180_s19, 4294967168  ;;  %v578_v0 = vmov 0   ;;  %v211_v1 = vld [vmem:[%s183_s21] sm:$0xff]  ;;  %v210_v2 = vld [vmem:[%s730_s2] sm:$0xf]  ;;  %vm225_vm0 = vcmask 1043456  }
  0x21   : > { %463 = vset.pattern.permute.xlu0 %v578_v0  ;;  %218 = vst [vmem:[#allocation1] ss:$2 sm:$0xff] %v211_v1  ;;  %v209_v3 = vld [vmem:[%s729_s1] sm:$0xf]  ;;  %vm221_vm1 = vcmask 31744   ;;  %s399_s24 = sshll.u32 %s568_s15, 3 }
  0x22   : > { %214 = vperm.xlu0 %463, %v210_v2   ;;  %s290_s5 = scalar_lea.hbm %s731_s3, %s399_s24  ;;  %s206_s6 = scalar_lea.vmem [#allocation5], %s387_s18 }
  0x23   : > { %s292_s7 = sshll.u32 %s206_s6, 4  ;;  %s294_s8 = sshll.u32 %s290_s5, 4  ;;  %s293_s7 = int_to_ptr.vmem [resolvable:$true] %s292_s7  ;;  %s295_s8 = int_to_ptr.hbm [resolvable:$true] %s294_s8 }
  0x24   : > { %s277_s15 = scalar_lea.sflag [#allocation4], %s673_s11  ;;  %s508_s9 = sshra.s32 %s295_s8, 4  ;;  %s509_s9 = int_to_ptr.hbm [resolvable:$true] %s508_s9 }
  0x25   : > { %s510_s10 = scalar_lea.hbm %s509_s9, 8  ;;  %s514_s18 = scalar_lea.hbm %s731_s3, 16 }
  0x26   : > { %p511_p4 = scmp.ne.s32.totalorder %s509_s9, %s510_s10  ;;  %p515_p7 = scmp.lt.s32.totalorder %s509_s9, %s731_s3 }
  0x27   : > { %p516_p8 = scmp.lt.s32.totalorder %s514_s18, %s510_s10 }
  0x28   : > { %v219_v4 = vld.sshfl [vmem:[#allocation1] sm:$0xff pattern:$0x75316420]  ;;  %v220_v5 = vld.sshfl [vmem:[#allocation1 + $0x8] sm:$0xff pattern:$0x75316420]  ;;  %p512_p5 = pnand %p511_p4, %p650_p9 }
  0x29   : > { %389 = vmatpush.msk.msra.mxu0 %vm225_vm0, %v219_v4  ;;  %391 = vmatpush.msk.msra.mxu1 %vm225_vm0, %v220_v5  ;;  %p517_p10 = por %p516_p8, %p515_p7 }
  0x2a   : > { %390 = vmatmul.msk.f32.vlgmr.msra.gmra.mxu0 %vm221_vm1, %v209_v3  ;;  %392 = vmatmul.msk.f32.vlgmr.msra.gmra.mxu1 %vm221_vm1, %v209_v3  ;;  %p513_p6 = pneg %p512_p5 }
  0x2c   : > { %p518_p13 = pnand %p517_p10, %p513_p6 }
  0x94   : > { %v215_v6 = vpop.permute.xlu0 %214 }
  0xa7   : > { %v247_v7 = vpop.f32.mrf.mxu0  ;;  %v267_v8 = vpop.f32.mrf.mxu1 }
  0xa8   : > { %v268_v9 = vadd.f32 %v267_v8, %v215_v6  ;;  %v248_v10 = vadd.f32 %v247_v7, %v215_v6 }
  0xaa   : > { %v272_v11 = vrot.slane %v268_v9, 4 }
  0xac   : > { %v273_v12 = vsel %vm225_vm0, %v248_v10, %v272_v11 }
  0xad   : > { %275 = vst [vmem:[%s206_s6] sm:$0xff] %v273_v12 }
  0xae   : > { %521 = shalt.err (!%p518_p13)
}
  0xaf   : > { %402 = dma.vmem_to_hbm [thread:$0]  (%p650_p9), %s293_s7, 128, %s295_s8, %s277_s15  }
  0xb0 PF: > { %s306_s11 = sand.u32 1, %s556_s12   ;;  %p409_p0 = pnand %p382_p12, %p657_p11 }
  0xb1   : > { %s307_s28 = scalar_lea.sflag [#allocation4], %s306_s11 }
  0xb2   : > { %p410_p1 = pneg %p409_p0 }
  0xb4   : > { %551 = dma.done.wait (%p410_p1), %s307_s28, 128  }
  0xb5   : > { %553 = vsyncadd (%p410_p1), %s307_s28, 4294967168  ;;  %s19_s17 = sadd.s32 1, %s576_s17   ;;  %s736_s12 = smov %s560_s13 }
  0xb6   : > { %p16_p2 = scmp.ge.s32.totalorder %s19_s17, 4   ;;  %s737_s13 = smov %s564_s14 }
  0xb7   : > { %s738_s14 = smov %s655_s26  ;;  %s739_s15 = smov %s572_s16 }
  0xb8   : > { %s740_s16 = smov %s742_s20  ;;  %18 = sbr.rel (!%p16_p2) target bundleno = 6 (0x6), region = 77 }
  0xbd   :  { %313 = vsyncpa [#allocation3], 1 }
  0xbe   :  { %315 = vsyncpa [#allocation3 + $0x1], 1 }
  0xbf   :  { %316 = vsyncpa [#allocation4], 1 }
  0xc0   :  { %318 = vsyncpa [#allocation4 + $0x1], 1 }

</bundles_post_ra>
